<compile_context>
chip_gen: v5e
topology: v5e:2x2
jax: 0.10.0
libtpu: 0.0.40
codegen_flags: <defaults>
</compile_context>

<pallas_src>
import functools

import jax
import jax.numpy as jnp
from jax.experimental import pallas as pl
from jax.experimental.pallas import tpu as pltpu


# ---------------------------------------------------------------------------
# Kernel
# ---------------------------------------------------------------------------
def block_kernel(x_ref, ln1g_ref, ln1b_ref, wqkv_ref, cos_ref, sin_ref,
                 wo_ref, bo_ref, ln2g_ref, ln2b_ref,
                 wff1_ref, bff1_ref, wff2_ref, bff2_ref,
                 o_ref,
                 heads_ref, qrot_ref, krot_ref,
                 *, num_heads, head_size):
    """One grid step == one batch element.  All operands live in VMEM."""
    H = head_size
    half = H // 2
    C = num_heads * H

    x = x_ref[0]                                   # (T, C), native dtype
    xf = x.astype(jnp.float32)
    T = xf.shape[0]

    # ---- LayerNorm 1 (f32 math, eps = 1e-5 like nn.LayerNorm) ----
    mu = jnp.mean(xf, axis=-1, keepdims=True)
    var = jnp.mean(jnp.square(xf - mu), axis=-1, keepdims=True)
    xn = (xf - mu) * jax.lax.rsqrt(var + 1e-5)
    xn = xn * ln1g_ref[...].astype(jnp.float32) + ln1b_ref[...].astype(jnp.float32)
    xn = xn.astype(x.dtype)                        # matmul inputs stay native dtype

    # ---- fused QKV projection: one (T,C) @ (C,3C) MXU matmul ----
    qkv = jnp.dot(xn, wqkv_ref[...], preferred_element_type=jnp.float32)  # (T,3C) f32

    cos = cos_ref[...]                             # (T, H/2) f32
    sin = sin_ref[...]                             # (T, H/2) f32

    # causal mask, built once
    rows = jax.lax.broadcasted_iota(jnp.int32, (T, T), 0)
    cols = jax.lax.broadcasted_iota(jnp.int32, (T, T), 1)
    causal = cols <= rows

    # ---- per-head attention (static, unrolled) ----
    for h in range(num_heads):
        q0 = h * H
        k0 = C + h * H
        v0 = 2 * C + h * H
        qa = qkv[:, q0:q0 + half]
        qb = qkv[:, q0 + half:q0 + H]
        ka = qkv[:, k0:k0 + half]
        kb = qkv[:, k0 + half:k0 + H]
        vh = qkv[:, v0:v0 + H]

        # RoPE in rotate-half layout (Wq/Wk columns were permuted offline;
        # 1/sqrt(H) is already folded into Wq).  Pure VPU math, no extra MXU.
        qrot_ref[:, :half] = qa * cos - qb * sin
        qrot_ref[:, half:] = qa * sin + qb * cos
        krot_ref[:, :half] = ka * cos - kb * sin
        krot_ref[:, half:] = ka * sin + kb * cos

        s = jnp.dot(qrot_ref[...], krot_ref[...].T,
                    preferred_element_type=jnp.float32)          # (T, T)
        s = jnp.where(causal, s, -jnp.inf)
        m = jnp.max(s, axis=-1, keepdims=True)
        e = jnp.exp(s - m)
        denom = jnp.sum(e, axis=-1, keepdims=True)
        w = e * pl.reciprocal(denom, approx=True)                # EUP, no divide
        # TODO(synk): attention-weight dropout omitted (eval semantics).
        heads_ref[:, h * H:(h + 1) * H] = jnp.dot(
            w.astype(x.dtype), vh.astype(x.dtype),
            preferred_element_type=jnp.float32)

    # ---- output projection + residual ----
    att = heads_ref[...].astype(x.dtype)                         # (T, C)
    y = xf + jnp.dot(att, wo_ref[...], preferred_element_type=jnp.float32) \
           + bo_ref[...].astype(jnp.float32)                     # (T, C) f32

    # ---- LayerNorm 2 + FeedForward + residual ----
    mu2 = jnp.mean(y, axis=-1, keepdims=True)
    var2 = jnp.mean(jnp.square(y - mu2), axis=-1, keepdims=True)
    yn = (y - mu2) * jax.lax.rsqrt(var2 + 1e-5)
    yn = yn * ln2g_ref[...].astype(jnp.float32) + ln2b_ref[...].astype(jnp.float32)
    yn = yn.astype(x.dtype)

    hdn = jnp.dot(yn, wff1_ref[...], preferred_element_type=jnp.float32) \
          + bff1_ref[...].astype(jnp.float32)
    hdn = jnp.maximum(hdn, 0.0).astype(x.dtype)
    out = y + jnp.dot(hdn, wff2_ref[...], preferred_element_type=jnp.float32) \
            + bff2_ref[...].astype(jnp.float32)
    # TODO(synk): projection / FFN dropout omitted (eval semantics).
    o_ref[0] = out.astype(o_ref.dtype)


# ---------------------------------------------------------------------------
# Wrapper
# ---------------------------------------------------------------------------
@functools.partial(jax.jit, static_argnames=("num_heads",))
def block_forward(x, wqkv, cos, sin, wo, bo, ln1_g, ln1_b, ln2_g, ln2_b,
                  wff1, bff1, wff2, bff2, *, num_heads):
    B, T, C = x.shape
    H = C // num_heads
    kern = functools.partial(block_kernel, num_heads=num_heads, head_size=H)

    def rep2(a):  # weight / table replicated across the batch grid
        return pl.BlockSpec(a.shape, lambda b: (0, 0))

    return pl.pallas_call(
        kern,
        out_shape=jax.ShapeDtypeStruct((B, T, C), x.dtype),
        grid=(B,),
        in_specs=[
            pl.BlockSpec((1, T, C), lambda b: (b, 0, 0)),   # x
            rep2(ln1_g), rep2(ln1_b),
            rep2(wqkv), rep2(cos), rep2(sin),
            rep2(wo), rep2(bo),
            rep2(ln2_g), rep2(ln2_b),
            rep2(wff1), rep2(bff1), rep2(wff2), rep2(bff2),
        ],
        out_specs=pl.BlockSpec((1, T, C), lambda b: (b, 0, 0)),
        scratch_shapes=[
            pltpu.VMEM((T, C), jnp.float32),   # per-head outputs (concat slab)
            pltpu.VMEM((T, H), jnp.float32),   # RoPE'd q for current head
            pltpu.VMEM((T, H), jnp.float32),   # RoPE'd k for current head
        ],
        compiler_params=pltpu.CompilerParams(
            dimension_semantics=("parallel",)),
    )(x, ln1_g, ln1_b, wqkv, cos, sin, wo, bo, ln2_g, ln2_b,
      wff1, bff1, wff2, bff2)


def fuse_block_params(params, num_heads, head_size, seq_len,
                      base_frequency=10000.0):
    """Offline weight prep: fuse Q/K/V across heads, permute Q/K columns to
    rotate-half layout, fold 1/sqrt(H) into Wq, build (T, H/2) RoPE tables."""
    H = head_size
    half = H // 2
    perm = jnp.concatenate([jnp.arange(0, H, 2), jnp.arange(1, H, 2)])
    scale = float(H) ** -0.5
    wq = jnp.concatenate([params["wq"][h][:, perm] for h in range(num_heads)],
                         axis=1) * scale
    wk = jnp.concatenate([params["wk"][h][:, perm] for h in range(num_heads)],
                         axis=1)
    wv = jnp.concatenate([params["wv"][h] for h in range(num_heads)], axis=1)
    wqkv = jnp.concatenate([wq, wk, wv], axis=1)                  # (C, 3C)

    inv = 1.0 / (base_frequency ** (2.0 * jnp.arange(half, dtype=jnp.float32) / H))
    ang = jnp.outer(jnp.arange(seq_len, dtype=jnp.float32), inv)  # (T, H/2)
    return wqkv, jnp.cos(ang), jnp.sin(ang)


# ---------------------------------------------------------------------------
# Pure-JAX reference (mirrors the PyTorch module, no dropout)
# ---------------------------------------------------------------------------
def reference_block(x, params, num_heads, base_frequency=10000.0):
    B, T, C = x.shape
    H = C // num_heads
    half = H // 2
    inv = 1.0 / (base_frequency ** (2.0 * jnp.arange(half, dtype=jnp.float32) / H))
    ang = jnp.outer(jnp.arange(T, dtype=jnp.float32), inv)
    cos = jnp.cos(ang)[None]
    sin = jnp.sin(ang)[None]

    def rope(z):                                  # interleaved (even, odd) pairs
        ze, zo = z[..., 0::2], z[..., 1::2]
        re = ze * cos - zo * sin
        im = ze * sin + zo * cos
        return jnp.stack([re, im], axis=-1).reshape(z.shape)

    def layernorm(z, g, b):
        mu = jnp.mean(z, axis=-1, keepdims=True)
        var = jnp.mean((z - mu) ** 2, axis=-1, keepdims=True)
        return (z - mu) / jnp.sqrt(var + 1e-5) * g + b

    xn = layernorm(x, params["ln1_g"], params["ln1_b"])
    mask = jnp.tril(jnp.ones((T, T), dtype=bool))
    heads = []
    for h in range(num_heads):
        q = xn @ params["wq"][h]
        k = xn @ params["wk"][h]
        v = xn @ params["wv"][h]
        q, k = rope(q), rope(k)
        s = (q @ jnp.swapaxes(k, -1, -2)) * (H ** -0.5)
        s = jnp.where(mask[None], s, -jnp.inf)
        w = jax.nn.softmax(s, axis=-1)
        heads.append(w @ v)
    att = jnp.concatenate(heads, axis=-1) @ params["wo"] + params["bo"]
    y = x + att
    yn = layernorm(y, params["ln2_g"], params["ln2_b"])
    ff = jnp.maximum(yn @ params["wff1"] + params["bff1"], 0.0) \
         @ params["wff2"] + params["bff2"]
    return y + ff


# ---------------------------------------------------------------------------
if __name__ == "__main__":
    B, T, C = 2, 8, 32            # batch, seq, embedding_size
    num_heads = 2                 # head_size = 16
    H = C // num_heads

    key = jax.random.PRNGKey(0)
    keys = jax.random.split(key, 16)
    x = jax.random.normal(keys[0], (B, T, C), dtype=jnp.float32)
    params = {
        "ln1_g": 1.0 + 0.1 * jax.random.normal(keys[1], (C,), jnp.float32),
        "ln1_b": 0.1 * jax.random.normal(keys[2], (C,), jnp.float32),
        "wq": 0.1 * jax.random.normal(keys[3], (num_heads, C, H), jnp.float32),
        "wk": 0.1 * jax.random.normal(keys[4], (num_heads, C, H), jnp.float32),
        "wv": 0.1 * jax.random.normal(keys[5], (num_heads, C, H), jnp.float32),
        "wo": 0.1 * jax.random.normal(keys[6], (C, C), jnp.float32),
        "bo": 0.1 * jax.random.normal(keys[7], (C,), jnp.float32),
        "ln2_g": 1.0 + 0.1 * jax.random.normal(keys[8], (C,), jnp.float32),
        "ln2_b": 0.1 * jax.random.normal(keys[9], (C,), jnp.float32),
        "wff1": 0.1 * jax.random.normal(keys[10], (C, 4 * C), jnp.float32),
        "bff1": 0.1 * jax.random.normal(keys[11], (4 * C,), jnp.float32),
        "wff2": 0.1 * jax.random.normal(keys[12], (4 * C, C), jnp.float32),
        "bff2": 0.1 * jax.random.normal(keys[13], (C,), jnp.float32),
    }

    wqkv, cos, sin = fuse_block_params(params, num_heads, H, T)

    out = block_forward(
        x, wqkv, cos, sin,
        params["wo"], params["bo"].reshape(1, C),
        params["ln1_g"].reshape(1, C), params["ln1_b"].reshape(1, C),
        params["ln2_g"].reshape(1, C), params["ln2_b"].reshape(1, C),
        params["wff1"], params["bff1"].reshape(1, 4 * C),
        params["wff2"], params["bff2"].reshape(1, C),
        num_heads=num_heads)
    out = jax.block_until_ready(out)

    ref = reference_block(x, params, num_heads)
    assert out.shape == (B, T, C)
    err = float(jnp.max(jnp.abs(out - ref)))
    assert jnp.allclose(out, ref, atol=3e-3, rtol=3e-3), f"mismatch vs reference: {err}"

    print("KERNEL_OK")
</pallas_src>

<mosaic_0001>
module attributes {stable_mosaic.version = 11 : i64} {
  func.func @block_kernel(%arg0: i32, %arg1: memref<1x8x32xf32, #tpu.memory_space<vmem>>, %arg2: memref<1x32xf32, #tpu.memory_space<vmem>>, %arg3: memref<1x32xf32, #tpu.memory_space<vmem>>, %arg4: memref<32x96xf32, #tpu.memory_space<vmem>>, %arg5: memref<8x8xf32, #tpu.memory_space<vmem>>, %arg6: memref<8x8xf32, #tpu.memory_space<vmem>>, %arg7: memref<32x32xf32, #tpu.memory_space<vmem>>, %arg8: memref<1x32xf32, #tpu.memory_space<vmem>>, %arg9: memref<1x32xf32, #tpu.memory_space<vmem>>, %arg10: memref<1x32xf32, #tpu.memory_space<vmem>>, %arg11: memref<32x128xf32, #tpu.memory_space<vmem>>, %arg12: memref<1x128xf32, #tpu.memory_space<vmem>>, %arg13: memref<128x32xf32, #tpu.memory_space<vmem>>, %arg14: memref<1x32xf32, #tpu.memory_space<vmem>>, %arg15: memref<1x8x32xf32, #tpu.memory_space<vmem>>, %arg16: memref<8x32xf32, #tpu.memory_space<vmem>>, %arg17: memref<8x16xf32, #tpu.memory_space<vmem>>, %arg18: memref<8x16xf32, #tpu.memory_space<vmem>>) attributes {dimension_semantics = [#tpu.dimension_semantics<parallel>], iteration_bounds = array<i64: 2>, scalar_prefetch = 0 : i64, scratch_operands = 3 : i64, tpu.core_type = #tpu.core_type<tc>, window_params = [{transform_indices = @transform_0, window_bounds = array<i64: 1, 8, 32>}, {pipeline_mode = #tpu.pipeline_mode<synchronous>, transform_indices = @transform_1, window_bounds = array<i64: 1, 32>}, {pipeline_mode = #tpu.pipeline_mode<synchronous>, transform_indices = @transform_2, window_bounds = array<i64: 1, 32>}, {pipeline_mode = #tpu.pipeline_mode<synchronous>, transform_indices = @transform_3, window_bounds = array<i64: 32, 96>}, {pipeline_mode = #tpu.pipeline_mode<synchronous>, transform_indices = @transform_4, window_bounds = array<i64: 8, 8>}, {pipeline_mode = #tpu.pipeline_mode<synchronous>, transform_indices = @transform_5, window_bounds = array<i64: 8, 8>}, {pipeline_mode = #tpu.pipeline_mode<synchronous>, transform_indices = @transform_6, window_bounds = array<i64: 32, 32>}, {pipeline_mode = #tpu.pipeline_mode<synchronous>, transform_indices = @transform_7, window_bounds = array<i64: 1, 32>}, {pipeline_mode = #tpu.pipeline_mode<synchronous>, transform_indices = @transform_8, window_bounds = array<i64: 1, 32>}, {pipeline_mode = #tpu.pipeline_mode<synchronous>, transform_indices = @transform_9, window_bounds = array<i64: 1, 32>}, {pipeline_mode = #tpu.pipeline_mode<synchronous>, transform_indices = @transform_10, window_bounds = array<i64: 32, 128>}, {pipeline_mode = #tpu.pipeline_mode<synchronous>, transform_indices = @transform_11, window_bounds = array<i64: 1, 128>}, {pipeline_mode = #tpu.pipeline_mode<synchronous>, transform_indices = @transform_12, window_bounds = array<i64: 128, 32>}, {pipeline_mode = #tpu.pipeline_mode<synchronous>, transform_indices = @transform_13, window_bounds = array<i64: 1, 32>}, {transform_indices = @transform_14, window_bounds = array<i64: 1, 8, 32>}]} {
    %c0 = arith.constant 0 : index
    %c0_0 = arith.constant 0 : index
    %c0_1 = arith.constant 0 : index
    %0 = vector.load %arg1[%c0, %c0_0, %c0_1] : memref<1x8x32xf32, #tpu.memory_space<vmem>>, vector<1x8x32xf32>
    %1 = vector.shape_cast %0 : vector<1x8x32xf32> to vector<8x32xf32>
    %cst = arith.constant dense<0.000000e+00> : vector<8xf32>
    %2 = vector.multi_reduction <add>, %1, %cst [1] : vector<8x32xf32> to vector<8xf32>
    %3 = vector.shape_cast %2 : vector<8xf32> to vector<8x1xf32>
    %cst_2 = arith.constant 3.200000e+01 : f32
    %4 = vector.broadcast %cst_2 : f32 to vector<8x1xf32>
    %5 = arith.divf %3, %4 : vector<8x1xf32>
    %6 = vector.broadcast %5 : vector<8x1xf32> to vector<8x32xf32>
    %7 = arith.subf %1, %6 : vector<8x32xf32>
    %8 = arith.mulf %7, %7 : vector<8x32xf32>
    %cst_3 = arith.constant dense<0.000000e+00> : vector<8xf32>
    %9 = vector.multi_reduction <add>, %8, %cst_3 [1] : vector<8x32xf32> to vector<8xf32>
    %10 = vector.shape_cast %9 : vector<8xf32> to vector<8x1xf32>
    %cst_4 = arith.constant 3.200000e+01 : f32
    %11 = vector.broadcast %cst_4 : f32 to vector<8x1xf32>
    %12 = arith.divf %10, %11 : vector<8x1xf32>
    %13 = vector.broadcast %5 : vector<8x1xf32> to vector<8x32xf32>
    %14 = arith.subf %1, %13 : vector<8x32xf32>
    %cst_5 = arith.constant 9.99999974E-6 : f32
    %15 = vector.broadcast %cst_5 : f32 to vector<8x1xf32>
    %16 = arith.addf %12, %15 : vector<8x1xf32>
    %17 = math.rsqrt %16 : vector<8x1xf32>
    %18 = vector.broadcast %17 : vector<8x1xf32> to vector<8x32xf32>
    %19 = arith.mulf %14, %18 : vector<8x32xf32>
    %c0_6 = arith.constant 0 : index
    %c0_7 = arith.constant 0 : index
    %20 = vector.load %arg2[%c0_6, %c0_7] : memref<1x32xf32, #tpu.memory_space<vmem>>, vector<1x32xf32>
    %21 = vector.broadcast %20 : vector<1x32xf32> to vector<8x32xf32>
    %22 = arith.mulf %19, %21 : vector<8x32xf32>
    %c0_8 = arith.constant 0 : index
    %c0_9 = arith.constant 0 : index
    %23 = vector.load %arg3[%c0_8, %c0_9] : memref<1x32xf32, #tpu.memory_space<vmem>>, vector<1x32xf32>
    %24 = vector.broadcast %23 : vector<1x32xf32> to vector<8x32xf32>
    %25 = arith.addf %22, %24 : vector<8x32xf32>
    %c0_10 = arith.constant 0 : index
    %c0_11 = arith.constant 0 : index
    %26 = vector.load %arg4[%c0_10, %c0_11] : memref<32x96xf32, #tpu.memory_space<vmem>>, vector<32x96xf32>
    %cst_12 = arith.constant dense<0.000000e+00> : vector<8x96xf32>
    %27 = tpu.matmul %25, %26, %cst_12 {dimension_numbers = #tpu.dot_dimension_numbers<[1], [0], [0], [1], [0, 0, 1, 1], [], []>} : vector<8x32xf32>, vector<32x96xf32>, vector<8x96xf32> -> vector<8x96xf32>
    %c0_13 = arith.constant 0 : index
    %c0_14 = arith.constant 0 : index
    %28 = vector.load %arg5[%c0_13, %c0_14] : memref<8x8xf32, #tpu.memory_space<vmem>>, vector<8x8xf32>
    %c0_15 = arith.constant 0 : index
    %c0_16 = arith.constant 0 : index
    %29 = vector.load %arg6[%c0_15, %c0_16] : memref<8x8xf32, #tpu.memory_space<vmem>>, vector<8x8xf32>
    %30 = tpu.iota {dimensions = array<i32: 0>} : vector<8x8xi32>
    %31 = tpu.iota {dimensions = array<i32: 1>} : vector<8x8xi32>
    %32 = arith.cmpi sle, %31, %30 : vector<8x8xi32>
    %33 = vector.extract_strided_slice %27 {offsets = [0, 0], sizes = [8, 8], strides = [1, 1]} : vector<8x96xf32> to vector<8x8xf32>
    %34 = vector.extract_strided_slice %27 {offsets = [0, 8], sizes = [8, 8], strides = [1, 1]} : vector<8x96xf32> to vector<8x8xf32>
    %35 = vector.extract_strided_slice %27 {offsets = [0, 32], sizes = [8, 8], strides = [1, 1]} : vector<8x96xf32> to vector<8x8xf32>
    %36 = vector.extract_strided_slice %27 {offsets = [0, 40], sizes = [8, 8], strides = [1, 1]} : vector<8x96xf32> to vector<8x8xf32>
    %37 = vector.extract_strided_slice %27 {offsets = [0, 64], sizes = [8, 16], strides = [1, 1]} : vector<8x96xf32> to vector<8x16xf32>
    %38 = arith.mulf %33, %28 : vector<8x8xf32>
    %39 = arith.mulf %34, %29 : vector<8x8xf32>
    %40 = arith.subf %38, %39 : vector<8x8xf32>
    %c0_17 = arith.constant 0 : index
    %c0_18 = arith.constant 0 : index
    %41 = vector.load %arg17[%c0_17, %c0_18] : memref<8x16xf32, #tpu.memory_space<vmem>>, vector<8x8xf32>
    tpu.vector_store %arg17[%c0_17, %c0_18], %40 {strides = array<i32>} : memref<8x16xf32, #tpu.memory_space<vmem>>, vector<8x8xf32>,
    %42 = arith.mulf %33, %29 : vector<8x8xf32>
    %43 = arith.mulf %34, %28 : vector<8x8xf32>
    %44 = arith.addf %42, %43 : vector<8x8xf32>
    %c0_19 = arith.constant 0 : index
    %c8 = arith.constant 8 : index
    %45 = vector.load %arg17[%c0_19, %c8] : memref<8x16xf32, #tpu.memory_space<vmem>>, vector<8x8xf32>
    tpu.vector_store %arg17[%c0_19, %c8], %44 {strides = array<i32>} : memref<8x16xf32, #tpu.memory_space<vmem>>, vector<8x8xf32>,
    %46 = arith.mulf %35, %28 : vector<8x8xf32>
    %47 = arith.mulf %36, %29 : vector<8x8xf32>
    %48 = arith.subf %46, %47 : vector<8x8xf32>
    %c0_20 = arith.constant 0 : index
    %c0_21 = arith.constant 0 : index
    %49 = vector.load %arg18[%c0_20, %c0_21] : memref<8x16xf32, #tpu.memory_space<vmem>>, vector<8x8xf32>
    tpu.vector_store %arg18[%c0_20, %c0_21], %48 {strides = array<i32>} : memref<8x16xf32, #tpu.memory_space<vmem>>, vector<8x8xf32>,
    %50 = arith.mulf %35, %29 : vector<8x8xf32>
    %51 = arith.mulf %36, %28 : vector<8x8xf32>
    %52 = arith.addf %50, %51 : vector<8x8xf32>
    %c0_22 = arith.constant 0 : index
    %c8_23 = arith.constant 8 : index
    %53 = vector.load %arg18[%c0_22, %c8_23] : memref<8x16xf32, #tpu.memory_space<vmem>>, vector<8x8xf32>
    tpu.vector_store %arg18[%c0_22, %c8_23], %52 {strides = array<i32>} : memref<8x16xf32, #tpu.memory_space<vmem>>, vector<8x8xf32>,
    %c0_24 = arith.constant 0 : index
    %c0_25 = arith.constant 0 : index
    %54 = vector.load %arg17[%c0_24, %c0_25] : memref<8x16xf32, #tpu.memory_space<vmem>>, vector<8x16xf32>
    %c0_26 = arith.constant 0 : index
    %c0_27 = arith.constant 0 : index
    %55 = vector.load %arg18[%c0_26, %c0_27] : memref<8x16xf32, #tpu.memory_space<vmem>>, vector<8x16xf32>
    %56 = tpu.transpose %55, [1, 0] : vector<8x16xf32> -> vector<16x8xf32>
    %cst_28 = arith.constant dense<0.000000e+00> : vector<8x8xf32>
    %57 = tpu.matmul %54, %56, %cst_28 {dimension_numbers = #tpu.dot_dimension_numbers<[1], [0], [0], [1], [0, 0, 1, 1], [], []>} : vector<8x16xf32>, vector<16x8xf32>, vector<8x8xf32> -> vector<8x8xf32>
    %cst_29 = arith.constant 0xFF800000 : f32
    %58 = vector.broadcast %cst_29 : f32 to vector<8x8xf32>
    %59 = arith.select %32, %57, %58 : vector<8x8xi1>, vector<8x8xf32>
    %cst_30 = arith.constant dense<0xFF800000> : vector<8xf32>
    %60 = vector.multi_reduction <maximumf>, %59, %cst_30 [1] : vector<8x8xf32> to vector<8xf32>
    %61 = vector.shape_cast %60 : vector<8xf32> to vector<8x1xf32>
    %62 = vector.broadcast %61 : vector<8x1xf32> to vector<8x8xf32>
    %63 = arith.subf %59, %62 : vector<8x8xf32>
    %64 = math.exp %63 : vector<8x8xf32>
    %cst_31 = arith.constant dense<0.000000e+00> : vector<8xf32>
    %65 = vector.multi_reduction <add>, %64, %cst_31 [1] : vector<8x8xf32> to vector<8xf32>
    %66 = vector.shape_cast %65 : vector<8xf32> to vector<8x1xf32>
    %67 = tpu.reciprocal %66 {approx = true} : vector<8x1xf32> -> vector<8x1xf32>
    %68 = vector.broadcast %67 : vector<8x1xf32> to vector<8x8xf32>
    %69 = arith.mulf %64, %68 : vector<8x8xf32>
    %cst_32 = arith.constant dense<0.000000e+00> : vector<8x16xf32>
    %70 = tpu.matmul %69, %37, %cst_32 {dimension_numbers = #tpu.dot_dimension_numbers<[1], [0], [0], [1], [0, 0, 1, 1], [], []>} : vector<8x8xf32>, vector<8x16xf32>, vector<8x16xf32> -> vector<8x16xf32>
    %c0_33 = arith.constant 0 : index
    %c0_34 = arith.constant 0 : index
    %71 = vector.load %arg16[%c0_33, %c0_34] : memref<8x32xf32, #tpu.memory_space<vmem>>, vector<8x16xf32>
    tpu.vector_store %arg16[%c0_33, %c0_34], %70 {strides = array<i32>} : memref<8x32xf32, #tpu.memory_space<vmem>>, vector<8x16xf32>,
    %72 = vector.extract_strided_slice %27 {offsets = [0, 16], sizes = [8, 8], strides = [1, 1]} : vector<8x96xf32> to vector<8x8xf32>
    %73 = vector.extract_strided_slice %27 {offsets = [0, 24], sizes = [8, 8], strides = [1, 1]} : vector<8x96xf32> to vector<8x8xf32>
    %74 = vector.extract_strided_slice %27 {offsets = [0, 48], sizes = [8, 8], strides = [1, 1]} : vector<8x96xf32> to vector<8x8xf32>
    %75 = vector.extract_strided_slice %27 {offsets = [0, 56], sizes = [8, 8], strides = [1, 1]} : vector<8x96xf32> to vector<8x8xf32>
    %76 = vector.extract_strided_slice %27 {offsets = [0, 80], sizes = [8, 16], strides = [1, 1]} : vector<8x96xf32> to vector<8x16xf32>
    %77 = arith.mulf %72, %28 : vector<8x8xf32>
    %78 = arith.mulf %73, %29 : vector<8x8xf32>
    %79 = arith.subf %77, %78 : vector<8x8xf32>
    %c0_35 = arith.constant 0 : index
    %c0_36 = arith.constant 0 : index
    %80 = vector.load %arg17[%c0_35, %c0_36] : memref<8x16xf32, #tpu.memory_space<vmem>>, vector<8x8xf32>
    tpu.vector_store %arg17[%c0_35, %c0_36], %79 {strides = array<i32>} : memref<8x16xf32, #tpu.memory_space<vmem>>, vector<8x8xf32>,
    %81 = arith.mulf %72, %29 : vector<8x8xf32>
    %82 = arith.mulf %73, %28 : vector<8x8xf32>
    %83 = arith.addf %81, %82 : vector<8x8xf32>
    %c0_37 = arith.constant 0 : index
    %c8_38 = arith.constant 8 : index
    %84 = vector.load %arg17[%c0_37, %c8_38] : memref<8x16xf32, #tpu.memory_space<vmem>>, vector<8x8xf32>
    tpu.vector_store %arg17[%c0_37, %c8_38], %83 {strides = array<i32>} : memref<8x16xf32, #tpu.memory_space<vmem>>, vector<8x8xf32>,
    %85 = arith.mulf %74, %28 : vector<8x8xf32>
    %86 = arith.mulf %75, %29 : vector<8x8xf32>
    %87 = arith.subf %85, %86 : vector<8x8xf32>
    %c0_39 = arith.constant 0 : index
    %c0_40 = arith.constant 0 : index
    %88 = vector.load %arg18[%c0_39, %c0_40] : memref<8x16xf32, #tpu.memory_space<vmem>>, vector<8x8xf32>
    tpu.vector_store %arg18[%c0_39, %c0_40], %87 {strides = array<i32>} : memref<8x16xf32, #tpu.memory_space<vmem>>, vector<8x8xf32>,
    %89 = arith.mulf %74, %29 : vector<8x8xf32>
    %90 = arith.mulf %75, %28 : vector<8x8xf32>
    %91 = arith.addf %89, %90 : vector<8x8xf32>
    %c0_41 = arith.constant 0 : index
    %c8_42 = arith.constant 8 : index
    %92 = vector.load %arg18[%c0_41, %c8_42] : memref<8x16xf32, #tpu.memory_space<vmem>>, vector<8x8xf32>
    tpu.vector_store %arg18[%c0_41, %c8_42], %91 {strides = array<i32>} : memref<8x16xf32, #tpu.memory_space<vmem>>, vector<8x8xf32>,
    %c0_43 = arith.constant 0 : index
    %c0_44 = arith.constant 0 : index
    %93 = vector.load %arg17[%c0_43, %c0_44] : memref<8x16xf32, #tpu.memory_space<vmem>>, vector<8x16xf32>
    %c0_45 = arith.constant 0 : index
    %c0_46 = arith.constant 0 : index
    %94 = vector.load %arg18[%c0_45, %c0_46] : memref<8x16xf32, #tpu.memory_space<vmem>>, vector<8x16xf32>
    %95 = tpu.transpose %94, [1, 0] : vector<8x16xf32> -> vector<16x8xf32>
    %cst_47 = arith.constant dense<0.000000e+00> : vector<8x8xf32>
    %96 = tpu.matmul %93, %95, %cst_47 {dimension_numbers = #tpu.dot_dimension_numbers<[1], [0], [0], [1], [0, 0, 1, 1], [], []>} : vector<8x16xf32>, vector<16x8xf32>, vector<8x8xf32> -> vector<8x8xf32>
    %cst_48 = arith.constant 0xFF800000 : f32
    %97 = vector.broadcast %cst_48 : f32 to vector<8x8xf32>
    %98 = arith.select %32, %96, %97 : vector<8x8xi1>, vector<8x8xf32>
    %cst_49 = arith.constant dense<0xFF800000> : vector<8xf32>
    %99 = vector.multi_reduction <maximumf>, %98, %cst_49 [1] : vector<8x8xf32> to vector<8xf32>
    %100 = vector.shape_cast %99 : vector<8xf32> to vector<8x1xf32>
    %101 = vector.broadcast %100 : vector<8x1xf32> to vector<8x8xf32>
    %102 = arith.subf %98, %101 : vector<8x8xf32>
    %103 = math.exp %102 : vector<8x8xf32>
    %cst_50 = arith.constant dense<0.000000e+00> : vector<8xf32>
    %104 = vector.multi_reduction <add>, %103, %cst_50 [1] : vector<8x8xf32> to vector<8xf32>
    %105 = vector.shape_cast %104 : vector<8xf32> to vector<8x1xf32>
    %106 = tpu.reciprocal %105 {approx = true} : vector<8x1xf32> -> vector<8x1xf32>
    %107 = vector.broadcast %106 : vector<8x1xf32> to vector<8x8xf32>
    %108 = arith.mulf %103, %107 : vector<8x8xf32>
    %cst_51 = arith.constant dense<0.000000e+00> : vector<8x16xf32>
    %109 = tpu.matmul %108, %76, %cst_51 {dimension_numbers = #tpu.dot_dimension_numbers<[1], [0], [0], [1], [0, 0, 1, 1], [], []>} : vector<8x8xf32>, vector<8x16xf32>, vector<8x16xf32> -> vector<8x16xf32>
    %c0_52 = arith.constant 0 : index
    %c16 = arith.constant 16 : index
    %110 = vector.load %arg16[%c0_52, %c16] : memref<8x32xf32, #tpu.memory_space<vmem>>, vector<8x16xf32>
    tpu.vector_store %arg16[%c0_52, %c16], %109 {strides = array<i32>} : memref<8x32xf32, #tpu.memory_space<vmem>>, vector<8x16xf32>,
    %c0_53 = arith.constant 0 : index
    %c0_54 = arith.constant 0 : index
    %111 = vector.load %arg16[%c0_53, %c0_54] : memref<8x32xf32, #tpu.memory_space<vmem>>, vector<8x32xf32>
    %c0_55 = arith.constant 0 : index
    %c0_56 = arith.constant 0 : index
    %112 = vector.load %arg7[%c0_55, %c0_56] : memref<32x32xf32, #tpu.memory_space<vmem>>, vector<32x32xf32>
    %cst_57 = arith.constant dense<0.000000e+00> : vector<8x32xf32>
    %113 = tpu.matmul %111, %112, %cst_57 {dimension_numbers = #tpu.dot_dimension_numbers<[1], [0], [0], [1], [0, 0, 1, 1], [], []>} : vector<8x32xf32>, vector<32x32xf32>, vector<8x32xf32> -> vector<8x32xf32>
    %114 = arith.addf %1, %113 : vector<8x32xf32>
    %c0_58 = arith.constant 0 : index
    %c0_59 = arith.constant 0 : index
    %115 = vector.load %arg8[%c0_58, %c0_59] : memref<1x32xf32, #tpu.memory_space<vmem>>, vector<1x32xf32>
    %116 = vector.broadcast %115 : vector<1x32xf32> to vector<8x32xf32>
    %117 = arith.addf %114, %116 : vector<8x32xf32>
    %cst_60 = arith.constant dense<0.000000e+00> : vector<8xf32>
    %118 = vector.multi_reduction <add>, %117, %cst_60 [1] : vector<8x32xf32> to vector<8xf32>
    %119 = vector.shape_cast %118 : vector<8xf32> to vector<8x1xf32>
    %cst_61 = arith.constant 3.200000e+01 : f32
    %120 = vector.broadcast %cst_61 : f32 to vector<8x1xf32>
    %121 = arith.divf %119, %120 : vector<8x1xf32>
    %122 = vector.broadcast %121 : vector<8x1xf32> to vector<8x32xf32>
    %123 = arith.subf %117, %122 : vector<8x32xf32>
    %124 = arith.mulf %123, %123 : vector<8x32xf32>
    %cst_62 = arith.constant dense<0.000000e+00> : vector<8xf32>
    %125 = vector.multi_reduction <add>, %124, %cst_62 [1] : vector<8x32xf32> to vector<8xf32>
    %126 = vector.shape_cast %125 : vector<8xf32> to vector<8x1xf32>
    %cst_63 = arith.constant 3.200000e+01 : f32
    %127 = vector.broadcast %cst_63 : f32 to vector<8x1xf32>
    %128 = arith.divf %126, %127 : vector<8x1xf32>
    %129 = vector.broadcast %121 : vector<8x1xf32> to vector<8x32xf32>
    %130 = arith.subf %117, %129 : vector<8x32xf32>
    %cst_64 = arith.constant 9.99999974E-6 : f32
    %131 = vector.broadcast %cst_64 : f32 to vector<8x1xf32>
    %132 = arith.addf %128, %131 : vector<8x1xf32>
    %133 = math.rsqrt %132 : vector<8x1xf32>
    %134 = vector.broadcast %133 : vector<8x1xf32> to vector<8x32xf32>
    %135 = arith.mulf %130, %134 : vector<8x32xf32>
    %c0_65 = arith.constant 0 : index
    %c0_66 = arith.constant 0 : index
    %136 = vector.load %arg9[%c0_65, %c0_66] : memref<1x32xf32, #tpu.memory_space<vmem>>, vector<1x32xf32>
    %137 = vector.broadcast %136 : vector<1x32xf32> to vector<8x32xf32>
    %138 = arith.mulf %135, %137 : vector<8x32xf32>
    %c0_67 = arith.constant 0 : index
    %c0_68 = arith.constant 0 : index
    %139 = vector.load %arg10[%c0_67, %c0_68] : memref<1x32xf32, #tpu.memory_space<vmem>>, vector<1x32xf32>
    %140 = vector.broadcast %139 : vector<1x32xf32> to vector<8x32xf32>
    %141 = arith.addf %138, %140 : vector<8x32xf32>
    %c0_69 = arith.constant 0 : index
    %c0_70 = arith.constant 0 : index
    %142 = vector.load %arg11[%c0_69, %c0_70] : memref<32x128xf32, #tpu.memory_space<vmem>>, vector<32x128xf32>
    %cst_71 = arith.constant dense<0.000000e+00> : vector<8x128xf32>
    %143 = tpu.matmul %141, %142, %cst_71 {dimension_numbers = #tpu.dot_dimension_numbers<[1], [0], [0], [1], [0, 0, 1, 1], [], []>} : vector<8x32xf32>, vector<32x128xf32>, vector<8x128xf32> -> vector<8x128xf32>
    %c0_72 = arith.constant 0 : index
    %c0_73 = arith.constant 0 : index
    %144 = vector.load %arg12[%c0_72, %c0_73] : memref<1x128xf32, #tpu.memory_space<vmem>>, vector<1x128xf32>
    %145 = vector.broadcast %144 : vector<1x128xf32> to vector<8x128xf32>
    %146 = arith.addf %143, %145 : vector<8x128xf32>
    %cst_74 = arith.constant 0.000000e+00 : f32
    %147 = vector.broadcast %cst_74 : f32 to vector<8x128xf32>
    %148 = arith.maximumf %146, %147 : vector<8x128xf32>
    %c0_75 = arith.constant 0 : index
    %c0_76 = arith.constant 0 : index
    %149 = vector.load %arg13[%c0_75, %c0_76] : memref<128x32xf32, #tpu.memory_space<vmem>>, vector<128x32xf32>
    %cst_77 = arith.constant dense<0.000000e+00> : vector<8x32xf32>
    %150 = tpu.matmul %148, %149, %cst_77 {dimension_numbers = #tpu.dot_dimension_numbers<[1], [0], [0], [1], [0, 0, 1, 1], [], []>} : vector<8x128xf32>, vector<128x32xf32>, vector<8x32xf32> -> vector<8x32xf32>
    %151 = arith.addf %117, %150 : vector<8x32xf32>
    %c0_78 = arith.constant 0 : index
    %c0_79 = arith.constant 0 : index
    %152 = vector.load %arg14[%c0_78, %c0_79] : memref<1x32xf32, #tpu.memory_space<vmem>>, vector<1x32xf32>
    %153 = vector.broadcast %152 : vector<1x32xf32> to vector<8x32xf32>
    %154 = arith.addf %151, %153 : vector<8x32xf32>
    %c0_80 = arith.constant 0 : index
    %c0_81 = arith.constant 0 : index
    %c0_82 = arith.constant 0 : index
    %155 = vector.load %arg15[%c0_80, %c0_81, %c0_82] : memref<1x8x32xf32, #tpu.memory_space<vmem>>, vector<1x8x32xf32>
    %156 = vector.shape_cast %155 : vector<1x8x32xf32> to vector<8x32xf32>
    %157 = vector.shape_cast %154 : vector<8x32xf32> to vector<1x8x32xf32>
    tpu.vector_store %arg15[%c0_80, %c0_81, %c0_82], %157 {strides = array<i32>} : memref<1x8x32xf32, #tpu.memory_space<vmem>>, vector<1x8x32xf32>,
    return
  }
  func.func @transform_0(%arg0: i32) -> (i32, i32, i32) {
    %c0_i32 = arith.constant 0 : i32
    %c0_i32_0 = arith.constant 0 : i32
    %c0_i32_1 = arith.constant 0 : i32
    return %arg0, %c0_i32, %c0_i32_0 : i32, i32, i32
  }
  func.func @transform_1(%arg0: i32) -> (i32, i32) {
    %c0_i32 = arith.constant 0 : i32
    %c0_i32_0 = arith.constant 0 : i32
    %c0_i32_1 = arith.constant 0 : i32
    return %c0_i32, %c0_i32_0 : i32, i32
  }
  func.func @transform_2(%arg0: i32) -> (i32, i32) {
    %c0_i32 = arith.constant 0 : i32
    %c0_i32_0 = arith.constant 0 : i32
    %c0_i32_1 = arith.constant 0 : i32
    return %c0_i32, %c0_i32_0 : i32, i32
  }
  func.func @transform_3(%arg0: i32) -> (i32, i32) {
    %c0_i32 = arith.constant 0 : i32
    %c0_i32_0 = arith.constant 0 : i32
    %c0_i32_1 = arith.constant 0 : i32
    return %c0_i32, %c0_i32_0 : i32, i32
  }
  func.func @transform_4(%arg0: i32) -> (i32, i32) {
    %c0_i32 = arith.constant 0 : i32
    %c0_i32_0 = arith.constant 0 : i32
    %c0_i32_1 = arith.constant 0 : i32
    return %c0_i32, %c0_i32_0 : i32, i32
  }
  func.func @transform_5(%arg0: i32) -> (i32, i32) {
    %c0_i32 = arith.constant 0 : i32
    %c0_i32_0 = arith.constant 0 : i32
    %c0_i32_1 = arith.constant 0 : i32
    return %c0_i32, %c0_i32_0 : i32, i32
  }
  func.func @transform_6(%arg0: i32) -> (i32, i32) {
    %c0_i32 = arith.constant 0 : i32
    %c0_i32_0 = arith.constant 0 : i32
    %c0_i32_1 = arith.constant 0 : i32
    return %c0_i32, %c0_i32_0 : i32, i32
  }
  func.func @transform_7(%arg0: i32) -> (i32, i32) {
    %c0_i32 = arith.constant 0 : i32
    %c0_i32_0 = arith.constant 0 : i32
    %c0_i32_1 = arith.constant 0 : i32
    return %c0_i32, %c0_i32_0 : i32, i32
  }
  func.func @transform_8(%arg0: i32) -> (i32, i32) {
    %c0_i32 = arith.constant 0 : i32
    %c0_i32_0 = arith.constant 0 : i32
    %c0_i32_1 = arith.constant 0 : i32
    return %c0_i32, %c0_i32_0 : i32, i32
  }
  func.func @transform_9(%arg0: i32) -> (i32, i32) {
    %c0_i32 = arith.constant 0 : i32
    %c0_i32_0 = arith.constant 0 : i32
    %c0_i32_1 = arith.constant 0 : i32
    return %c0_i32, %c0_i32_0 : i32, i32
  }
  func.func @transform_10(%arg0: i32) -> (i32, i32) {
    %c0_i32 = arith.constant 0 : i32
    %c0_i32_0 = arith.constant 0 : i32
    %c0_i32_1 = arith.constant 0 : i32
    return %c0_i32, %c0_i32_0 : i32, i32
  }
  func.func @transform_11(%arg0: i32) -> (i32, i32) {
    %c0_i32 = arith.constant 0 : i32
    %c0_i32_0 = arith.constant 0 : i32
    %c0_i32_1 = arith.constant 0 : i32
    return %c0_i32, %c0_i32_0 : i32, i32
  }
  func.func @transform_12(%arg0: i32) -> (i32, i32) {
    %c0_i32 = arith.constant 0 : i32
    %c0_i32_0 = arith.constant 0 : i32
    %c0_i32_1 = arith.constant 0 : i32
    return %c0_i32, %c0_i32_0 : i32, i32
  }
  func.func @transform_13(%arg0: i32) -> (i32, i32) {
    %c0_i32 = arith.constant 0 : i32
    %c0_i32_0 = arith.constant 0 : i32
    %c0_i32_1 = arith.constant 0 : i32
    return %c0_i32, %c0_i32_0 : i32, i32
  }
  func.func @transform_14(%arg0: i32) -> (i32, i32, i32) {
    %c0_i32 = arith.constant 0 : i32
    %c0_i32_0 = arith.constant 0 : i32
    %c0_i32_1 = arith.constant 0 : i32
    return %arg0, %c0_i32, %c0_i32_0 : i32, i32, i32
  }
}

</mosaic_0001>

<bundles_post_ra>
// kernel: block_forward.1
= control target key start
LH: loop header
LB: loop body
LE: loop exit
PB: predicated region body
PF: predicated region fallthrough
CT: control target
= control target key end

     0   :  { %s1578_s0 = inlined_call_operand.vmem [shape: f32[2,8,32], index: 0, kind: input, shape index: {}]   ;;  %s1579_s1 = inlined_call_operand.vmem [shape: f32[1,32], index: 1, kind: input, shape index: {}]   ;;  %s1580_s2 = inlined_call_operand.vmem [shape: f32[1,32], index: 2, kind: input, shape index: {}]   ;;  %s1581_s3 = inlined_call_operand.vmem [shape: f32[32,96], index: 3, kind: input, shape index: {}]   ;;  %s1582_s4 = inlined_call_operand.vmem [shape: f32[8,8], index: 4, kind: input, shape index: {}]   ;;  %s1583_s5 = inlined_call_operand.vmem [shape: f32[8,8], index: 5, kind: input, shape index: {}]   ;;  %s1584_s6 = inlined_call_operand.vmem [shape: f32[32,32], index: 6, kind: input, shape index: {}]   ;;  %s1585_s7 = inlined_call_operand.vmem [shape: f32[1,32], index: 7, kind: input, shape index: {}]   ;;  %s1586_s8 = inlined_call_operand.vmem [shape: f32[1,32], index: 8, kind: input, shape index: {}]   ;;  %s1587_s9 = inlined_call_operand.vmem [shape: f32[1,32], index: 9, kind: input, shape index: {}]   ;;  %s1588_s10 = inlined_call_operand.vmem [shape: f32[32,128], index: 10, kind: input, shape index: {}]   ;;  %s1589_s11 = inlined_call_operand.vmem [shape: f32[1,128], index: 11, kind: input, shape index: {}]   ;;  %s1590_s12 = inlined_call_operand.vmem [shape: f32[128,32], index: 12, kind: input, shape index: {}]   ;;  %s1591_s13 = inlined_call_operand.vmem [shape: f32[1,32], index: 13, kind: input, shape index: {}]   ;;  %s1592_s14 = inlined_call_operand.hbm [shape: f32[2,8,32], index: 14, kind: output, shape index: {}]  }
   0x1   :  { %1593 = sst [smem:[#allocation9_spill]] %s1578_s0 }
   0x2   :  { %1594 = sst [smem:[#allocation10_spill]] %s1579_s1 }
   0x3   :  { %1595 = sst [smem:[#allocation11_spill]] %s1580_s2 }
   0x4   :  { %1596 = sst [smem:[#allocation12_spill]] %s1581_s3 }
   0x5   :  { %19 = vsyncpa [#allocation6], 0 }
   0x6   :  { %21 = vsyncpa [#allocation6 + $0x1], 0  ;;  %s1281_s29 = smov 0   ;;  %s1283_s30 = smov 0  }
   0x7   :  { %s1285_s15 = smov 0   ;;  %s1287_s16 = smov 0  }
   0x8 LB: > { %s1302_s17 = sadd.s32 4294967295, %s1189_s16   ;;  %s1033_s18 = sadd.s32 4294967294, %s1189_s16   ;;  %s1189_s16 = sphi %s1287_s16, %s1608_s16   ;;  %s1185_s15 = sphi %s1285_s15, %s1607_s15   ;;  %s1181_s30 = sphi %s1283_s30, %s1606_s30   ;;  %s1177_s29 = sphi %s1281_s29, %s1605_s29  }
   0x9   : > { %s1306_s19 = sadd.s32 1, %s1189_s16   ;;  %s333_s20 = sadd.s32 1, %s1185_s15 }
   0xa   : > { %s330_s21 = ssub.s32 %s1189_s16, %s1306_s19  ;;  %p343_p0 = scmp.ne.s32.totalorder %s1185_s15, %s1181_s30 }
   0xb   : > { %p331_p1 = scmp.eq.s32.totalorder %s330_s21, 0  ;;  %p344_p2 = scmp.eq.s32.totalorder %s1302_s17, 1 }
   0xc   : > { %p349_p3 = scmp.ne.s32.totalorder %s1181_s30, %s1177_s29  ;;  %p350_p4 = scmp.eq.s32.totalorder %s1033_s18, 1 }
   0xd   : > { %s1317_s22 = scalar_select %p331_p1, %s1185_s15, %s333_s20  }
   0xe   : > { %p1319_p5 = por %p344_p2, %p343_p0  ;;  %p1323_p6 = por %p350_p4, %p349_p3 }
   0xf   : > { %1597 = sst [smem:[#allocation8_spill]] %s1317_s22  ;;  %p1036_p7 = scmp.ge.s32.totalorder %s1189_s16, 1 }
  0x10   : > { %p414_p8 = scmp.lt.s32.totalorder %s1189_s16, 3 }
  0x12   : > { %p415_p9 = pnand %p1036_p7, %p414_p8 }
  0x13   : > { %p459_p10 = scmp.lt.s32.totalorder (!%p415_p9), %s1302_s17, 1  ;;  %s1600_s0 = sld [smem:[#allocation9_spill]] (!%p415_p9) }
  0x14   : > { %418 = sbr.rel (%p415_p9) target bundleno = 1999 (0x7cf), region = 76  ;;  %s1601_s3 = sld [smem:[#allocation12_spill]] (!%p415_p9) }
  0x15   : > { %s1194_s21 = smov (!%p415_p9), 56   ;;  %s1195_s22 = smov (!%p415_p9), 48  }
  0x16   : > { %s1196_s20 = smov (!%p415_p9), 24   ;;  %s1602_s1 = sld [smem:[#allocation10_spill]] (!%p415_p9) }
  0x17   : > { %s1603_s2 = sld [smem:[#allocation11_spill]] (!%p415_p9)  ;;  %s1198_s28 = smov (!%p415_p9), 16  }
  0x18   : > { %s1204_s27 = smov (!%p415_p9), 80  }
  0x19   : > { %s460_s25 = scalar_select %p459_p10, %s1302_s17, 1  ;;  %vm464_vm0 = vcmask 261120   ;;  %v1191_v2 = vmov 32.0   ;;  %v1346_v14 = vld [vmem:[%s1583_s5] sm:$0xff]  ;;  %vm549_vm5 = vcmask 64512   ;;  %vm566_vm6 = vcmask 130112  }
  0x1a   : > { %1113 = vrcp.f32 %v1191_v2  ;;  %v1351_v15 = vld [vmem:[%s1582_s4] sm:$0xff]  ;;  %v507_v16 = vld [vmem:[%s1601_s3 + $0x18] sm:$0xff]  ;;  %v506_v17 = vld [vmem:[%s1601_s3 + $0x10] sm:$0xff]  ;;  %vm606_vm7 = vcmask 130048   ;;  %vm815_vm9 = vcmask 261248  }
  0x1b   : > { %s1038_s26 = sshll.u32 %s460_s25, 3  ;;  %523 = vmatpush.msra.mxu2 %v507_v16  ;;  %v505_v18 = vld [vmem:[%s1601_s3 + $0x8] sm:$0xff]  ;;  %v504_v19 = vld [vmem:[%s1601_s3] sm:$0xff]  ;;  %s1202_s25 = smov 88  }
  0x1c   : > { %s462_s18 = scalar_lea.vmem %s1600_s0, %s1038_s26  ;;  %s1193_s0 = smov 8   ;;  %v1106_v29 = vld [vmem:[%s1602_s1] ss:$0 sm:$0xff] }
  0x1d   : > { %v1334_v0 = vld [vmem:[%s462_s18] sm:$0xff]  ;;  %s1192_s18 = smov 40   ;;  %553 = vrot.lane.b32.xlu2 %v1351_v15, %s1193_s0  ;;  %524 = vmatpush.msra.mxu2 %v506_v17  ;;  %s1203_s26 = smov 112  }
  0x1e   : > { %v465_v1 = vsel %vm464_vm0, %v1334_v0, 0.0  ;;  %572 = vrot.lane.b32.xlu1 %v1346_v14, %s1192_s18  ;;  %v1107_v32 = vld [vmem:[%s1603_s2] ss:$0 sm:$0xff]  ;;  %s456_s1 = sand.u32 1, %s1181_s30  }
  0x1f   : > { %466 = vadd.xlane.f32.xlu0 %v465_v1  ;;  %525 = vmatpush.msra.mxu2 %v505_v18 }
  0x20   : > { %v1114_v3 = vpop.eup %1113 }
  0x21   : > { %v469_v4 = vmul.f32 32.0, %v1114_v3  ;;  %vm473_vm1 = vweird.f32 %v1114_v3  ;;  %526 = vmatpush.msra.mxu2 %v504_v19 }
  0x23   : > { %v470_v5 = vsub.f32 1.0, %v469_v4 }
  0x25   : > { %v471_v6 = vmul.f32 %v1114_v3, %v470_v5  ;;  %713 = vrot.lane.b32.xlu2 %v1346_v14, %s1194_s21 }
  0x26   : > { %590 = vrot.lane.b32.xlu1 %v1351_v15, %s1192_s18  ;;  %s1201_s18 = smov 96  }
  0x27   : > { %v472_v7 = vadd.f32 %v1114_v3, %v471_v6 }
  0x29   : > { %v1338_v8 = vsel %vm473_vm1, %v1114_v3, %v472_v7 }
  0x2d   : > { %695 = vrot.lane.b32.xlu2 %v1351_v15, %s1196_s20 }
  0x2e   : > { %677 = vrot.lane.b32.xlu1 %v1346_v14, %s1196_s20  ;;  %s1199_s20 = smov 120  }
  0x77   : > { %v554_v35 = vpop.permute.xlu2 %553 }
  0x7f   : > { %v714_v36 = vpop.permute.xlu2 %713 }
  0x87   : > { %v696_v38 = vpop.permute.xlu2 %695 }
  0x90   : > { %v573_v37 = vpop.permute.xlu1 %572 }
  0x92   : > { %v467_v9 = vpop.xlane.xlu0 %466 }
  0x93   : > { %v475_v10 = vmul.f32 %v1338_v8, %v467_v9 }
  0x95   : > { %v476_v11 = vsub.f32 %v1334_v0, %v475_v10 }
  0x97   : > { %v477_v12 = vmul.f32 %v476_v11, %v476_v11 }
  0x98   : > { %v591_v39 = vpop.permute.xlu1 %590 }
  0x99   : > { %v478_v13 = vsel %vm464_vm0, %v477_v12, 0.0 }
  0x9a   : > { %479 = vadd.xlane.f32.xlu0 %v478_v13 }
  0xa0   : > { %v678_v41 = vpop.permute.xlu1 %677 }
  0xae   : > { %731 = vrot.lane.b32.xlu0 %v1351_v15, %s1194_s21  ;;  %s1197_s21 = smov 32  }
  0xaf   : > { %586 = vrot.lane.b32.xlu2 %v1346_v14, %s1197_s21  ;;  %568 = vrot.lane.b32.xlu1 %v1351_v15, %s1197_s21  ;;  %s1200_s21 = smov 104  }
  0xb6   : > { %727 = vrot.lane.b32.xlu0 %v1346_v14, %s1195_s22 }
  0xb7   : > { %540 = vrot.lane.b32.xlu2 %v1346_v14, %s1193_s0 }
  0xbf   : > { %709 = vrot.lane.b32.xlu2 %v1351_v15, %s1195_s22 }
  0xc7   : > { %673 = vrot.lane.b32.xlu2 %v1351_v15, %s1198_s28 }
 0x109   : > { %v587_v40 = vpop.permute.xlu2 %586 }
 0x10d   : > { %v480_v20 = vpop.xlane.xlu0 %479 }
 0x10e   : > { %v481_v21 = vmul.f32 %v480_v20, %v1338_v8 }
 0x110   : > { %v482_v22 = vadd.f32 1e-05, %v481_v21 }
 0x111   : > { %v541_v46 = vpop.permute.xlu2 %540 }
 0x112   : > { %1115 = vrsqrt.f32 %v482_v22  ;;  %vm489_vm3 = vweird.f32 %v482_v22 }
 0x118   : > { %v1116_v23 = vpop.eup %1115 }
 0x119   : > { %v484_v24 = vmul.f32 %v1116_v23, %v482_v22  ;;  %vm490_vm2 = vweird.f32 %v1116_v23  ;;  %v710_v53 = vpop.permute.xlu2 %709 }
 0x11a   : > { %vm491_vm4 = vmor %vm489_vm3, %vm490_vm2 }
 0x11b   : > { %v485_v25 = vmul.f32 %v1116_v23, %v484_v24 }
 0x11d   : > { %v486_v26 = vmul.f32 0.5, %v485_v25 }
 0x11f   : > { %v487_v27 = vsub.f32 1.5, %v486_v26 }
 0x120   : > { %v732_v47 = vpop.permute.xlu0 %731 }
 0x121   : > { %v488_v28 = vmul.f32 %v1116_v23, %v487_v27  ;;  %v674_v54 = vpop.permute.xlu2 %673  ;;  %v569_v60 = vpop.permute.xlu1 %568 }
 0x123   : > { %v492_v30 = vsel %vm491_vm4, %v1116_v23, %v488_v28 }
 0x124   : > { %v493_v31 = vmul.f32 %v492_v30, %v476_v11 }
 0x126   : > { %v498_v33 = vmul.f32 %v1106_v29, %v493_v31  ;;  %v533_v31 = vlaneseq }
 0x128   : > { %v503_v34 = vadd.f32 %v1107_v32, %v498_v33  ;;  %v728_v59 = vpop.permute.xlu0 %727  ;;  %v534_v32 = vshrl.u32 %v533_v31, 7  ;;  %v536_v33 = vand.u32 127, %v533_v31 }
 0x12a   : > { %1039 = vmatmul.msk.f32.vlgmr.msra.gmra.mxu2 %vm464_vm0, %v503_v34  ;;  %vm537_vm8 = vcmp.le.s32.totalorder %v536_v33, %v534_v32  ;;  %v920_v32 = vld [vmem:[%s1590_s12 + $0x28] sm:$0xff] }
 0x1ad   : > { %v1391_v42 = vpop.f32.mrf.mxu2 }
 0x1ae   : > { %v680_v43 = vmul.f32 %v678_v41, %v1391_v42  ;;  %v593_v44 = vmul.f32 %v591_v39, %v1391_v42  ;;  %v575_v45 = vmul.f32 %v573_v37, %v1391_v42  ;;  %v543_v48 = vmul.f32 %v541_v46, %v1391_v42 }
 0x1af   : > { %v734_v49 = vmul.f32 %v732_v47, %v1391_v42  ;;  %v556_v50 = vmul.f32 %v554_v35, %v1391_v42  ;;  %v698_v51 = vmul.f32 %v696_v38, %v1391_v42  ;;  %v716_v52 = vmul.f32 %v714_v36, %v1391_v42 }
 0x1b0   : > { %682 = vrot.lane.b32.xlu2 %v680_v43, %s1199_s20  ;;  %595 = vrot.lane.b32.xlu0 %v593_v44, %s1199_s20  ;;  %v538_v56 = vmul.f32 %v1351_v15, %v1391_v42  ;;  %v589_v61 = vmul.f32 %v587_v40, %v1391_v42  ;;  %v571_v62 = vmul.f32 %v569_v60, %v1391_v42  ;;  %v821_v60 = vld [vmem:[%s1584_s6 + $0x18] sm:$0xff] }
 0x1b1   : > { %577 = vrot.lane.b32.xlu1 %v575_v45, %s1199_s20  ;;  %v730_v4 = vmul.f32 %v728_v59, %v1391_v42  ;;  %v551_v5 = vmul.f32 %v1346_v14, %v1391_v42  ;;  %v676_v11 = vmul.f32 %v674_v54, %v1391_v42  ;;  %v712_v12 = vmul.f32 %v710_v53, %v1391_v42 }
 0x1b8   : > { %545 = vrot.lane.b32.xlu2 %v543_v48, %s1199_s20  ;;  %736 = vrot.lane.b32.xlu0 %v734_v49, %s1199_s20 }
 0x1b9   : > { %558 = vrot.lane.b32.xlu1 %v556_v50, %s1199_s20 }
 0x1c0   : > { %700 = vrot.lane.b32.xlu0 %v698_v51, %s1199_s20 }
 0x1c1   : > { %718 = vrot.lane.b32.xlu1 %v716_v52, %s1199_s20 }
 0x1c9   : > { %691 = vrot.lane.b32.xlu1 %v1346_v14, %s1198_s28 }
 0x20a   : > { %v683_v55 = vpop.permute.xlu2 %682 }
 0x20b   : > { %v685_v15 = vsub.f32 %v676_v11, %v683_v55 }
 0x212   : > { %v546_v57 = vpop.permute.xlu2 %545 }
 0x213   : > { %v548_v58 = vsub.f32 %v538_v56, %v546_v57 }
 0x215   : > { %550 = vst.msk [vmem:[#allocation3] sm:$0xff] %vm549_vm5, %v548_v58 }
 0x222   : > { %v596_v63 = vpop.permute.xlu0 %595 }
 0x223   : > { %v578_v1 = vpop.permute.xlu1 %577  ;;  %v598_v2 = vadd.f32 %v596_v63, %v589_v61  ;;  %v820_v61 = vld [vmem:[%s1584_s6 + $0x10] sm:$0xff]  ;;  %v818_v63 = vld [vmem:[%s1584_s6] sm:$0xff] }
 0x224   : > { %v580_v3 = vsub.f32 %v571_v62, %v578_v1  ;;  %v819_v62 = vld [vmem:[%s1584_s6 + $0x8] sm:$0xff] }
 0x225   : > { %600 = vrot.lane.b32.xlu0 %v598_v2, %s1200_s21 }
 0x226   : > { %582 = vrot.lane.b32.xlu1 %v580_v3, %s1201_s18  ;;  %v1108_v3 = vld [vmem:[%s1585_s7] ss:$0 sm:$0xff] }
 0x22a   : > { %v737_v6 = vpop.permute.xlu0 %736 }
 0x22b   : > { %v559_v7 = vpop.permute.xlu1 %558  ;;  %v739_v9 = vadd.f32 %v737_v6, %v730_v4 }
 0x22c   : > { %v561_v10 = vadd.f32 %v559_v7, %v551_v5 }
 0x22d   : > { %741 = vrot.lane.b32.xlu0 %v739_v9, %s1202_s25 }
 0x22e   : > { %563 = vrot.lane.b32.xlu1 %v561_v10, %s1193_s0  ;;  %s1205_s0 = smov 64  }
 0x232   : > { %v701_v18 = vpop.permute.xlu0 %700 }
 0x233   : > { %v719_v13 = vpop.permute.xlu1 %718 }
 0x234   : > { %v721_v16 = vsub.f32 %v712_v12, %v719_v13 }
 0x236   : > { %687 = vrot.lane.b32.xlu1 %v685_v15, %s1203_s26  ;;  %723 = vrot.lane.b32.xlu2 %v721_v16, %s1204_s27  ;;  %v886_v15 = vld [vmem:[%s1588_s10 + $0x18] sm:$0xff]  ;;  %v884_v16 = vld [vmem:[%s1588_s10 + $0x8] sm:$0xff] }
 0x23b   : > { %v692_v14 = vpop.permute.xlu1 %691 }
 0x23c   : > { %v694_v17 = vmul.f32 %v692_v14, %v1391_v42  ;;  %v883_v14 = vld [vmem:[%s1588_s10] sm:$0xff] }
 0x23e   : > { %v703_v19 = vadd.f32 %v701_v18, %v694_v17  ;;  %v930_v17 = vld [vmem:[%s1590_s12 + $0x78] sm:$0xff]  ;;  %v929_v18 = vld [vmem:[%s1590_s12 + $0x70] sm:$0xff] }
 0x23f   : > { %931 = vmatpush.msra.mxu0 %v930_v17 }
 0x240   : > { %705 = vrot.lane.b32.xlu2 %v703_v19, %s1199_s20  ;;  %v928_v19 = vld [vmem:[%s1590_s12 + $0x68] sm:$0xff] }
 0x241   : > { %932 = vmatpush.msra.mxu0 %v929_v18 }
 0x243   : > { %933 = vmatpush.msra.mxu0 %v928_v19 }
 0x290   : > { %v724_v23 = vpop.permute.xlu2 %723 }
 0x297   : > { %v601_v20 = vpop.permute.xlu0 %600 }
 0x298   : > { %v583_v21 = vpop.permute.xlu1 %582 }
 0x299   : > { %585 = vst.msk [vmem:[#allocation4] sm:$0xff] %vm549_vm5, %v583_v21 }
 0x29a   : > { %603 = vst.msk [vmem:[#allocation4] sm:$0xff] %vm566_vm6, %v601_v20  ;;  %v706_v28 = vpop.permute.xlu2 %705 }
 0x29f   : > { %v742_v25 = vpop.permute.xlu0 %741 }
 0x2a0   : > { %v564_v22 = vpop.permute.xlu1 %563 }
 0x2a1   : > { %567 = vst.msk [vmem:[#allocation3] sm:$0xff] %vm566_vm6, %v564_v22  ;;  %v605_v24 = vld [vmem:[#allocation4] sm:$0xff]  ;;  %v927_v22 = vld [vmem:[%s1590_s12 + $0x60] sm:$0xff] }
 0x2a2   : > { %1040 = vmatpush.xpose.msk.msra.mxu1 %vm606_vm7, %v605_v24  ;;  %726 = vst.msk [vmem:[#allocation4] sm:$0xff] %vm549_vm5, %v724_v23  ;;  %v926_v24 = vld [vmem:[%s1590_s12 + $0x58] sm:$0xff]  ;;  %934 = vmatpush.msra.mxu0 %v927_v22 }
 0x2a3   : > { %744 = vst.msk [vmem:[#allocation4] sm:$0xff] %vm566_vm6, %v742_v25  ;;  %v925_v25 = vld [vmem:[%s1590_s12 + $0x50] sm:$0xff] }
 0x2a4   : > { %935 = vmatpush.msra.mxu0 %v926_v24 }
 0x2a6   : > { %837 = vmatpush.msrb.mxu1 %v821_v60  ;;  %936 = vmatpush.msra.mxu0 %v925_v25 }
 0x2a8   : > { %v688_v26 = vpop.permute.xlu1 %687  ;;  %v604_v27 = vld [vmem:[#allocation3] sm:$0xff]  ;;  %838 = vmatpush.msrb.mxu1 %v820_v61 }
 0x2a9   : > { %1041 = vmatmul.msk.f32.vlgmr.msra.gmra.mxu1 %vm606_vm7, %v604_v27  ;;  %690 = vst.msk [vmem:[#allocation3] sm:$0xff] %vm549_vm5, %v688_v26  ;;  %v923_v26 = vld [vmem:[%s1590_s12 + $0x40] sm:$0xff] }
 0x2aa   : > { %708 = vst.msk [vmem:[#allocation3] sm:$0xff] %vm566_vm6, %v706_v28  ;;  %v746_v29 = vld [vmem:[#allocation4] sm:$0xff]  ;;  %839 = vmatpush.msrb.mxu1 %v819_v62  ;;  %v922_v28 = vld [vmem:[%s1590_s12 + $0x38] sm:$0xff] }
 0x2ab   : > { %1043 = vmatpush.xpose.msk.msra.mxu3 %vm606_vm7, %v746_v29 }
 0x2ac   : > { %840 = vmatpush.msrb.mxu1 %v818_v63 }
 0x2af   : > { %906 = vmatpush.msrb.mxu3 %v886_v15 }
 0x2b1   : > { %v745_v30 = vld [vmem:[#allocation3] sm:$0xff] }
 0x2b2   : > { %1044 = vmatmul.msk.f32.vlgmr.msra.gmra.mxu3 %vm606_vm7, %v745_v30  ;;  %v921_v30 = vld [vmem:[%s1590_s12 + $0x30] sm:$0xff] }
 0x326   : > { %v630_v34 = vpop.f32.mrf.mxu1 }
 0x327   : > { %v633_v35 = vsel %vm537_vm8, %v630_v34, -inf  ;;  %v919_v34 = vld [vmem:[%s1590_s12 + $0x20] sm:$0xff] }
 0x328   : > { %v634_v36 = vsel %vm549_vm5, %v633_v35, -inf }
 0x329   : > { %635 = vmax.xlane.f32.xlu0 %v634_v36  ;;  %v918_v36 = vld [vmem:[%s1590_s12 + $0x18] sm:$0xff] }
 0x335   : > { %v770_v37 = vpop.f32.mrf.mxu3 }
 0x336   : > { %v773_v38 = vsel %vm537_vm8, %v770_v37, -inf }
 0x337   : > { %v774_v39 = vsel %vm549_vm5, %v773_v38, -inf }
 0x338   : > { %775 = vmax.xlane.f32.xlu1 %v774_v39 }
 0x351   : > { %785 = vrot.lane.b32.xlu1 %v1391_v42, %s1195_s22 }
 0x39c   : > { %v636_v40 = vpop.xlane.xlu0 %635 }
 0x39d   : > { %v637_v41 = vsub.f32 %v633_v35, %v636_v40 }
 0x39f   : > { %v638_v43 = vmul.f32 1.442695, %v637_v41  ;;  %v1110_v41 = vld [vmem:[%s1587_s9] ss:$0 sm:$0xff] }
 0x3a1   : > { %1117 = vpow2.f32 %v638_v43 }
 0x3a7   : > { %v1118_v44 = vpop.eup %1117 }
 0x3a8   : > { %v640_v45 = vsel %vm549_vm5, %v1118_v44, 0.0 }
 0x3a9   : > { %641 = vadd.xlane.f32.xlu2 %v640_v45  ;;  %v917_v45 = vld [vmem:[%s1590_s12 + $0x10] sm:$0xff] }
 0x3ab   : > { %v776_v46 = vpop.xlane.xlu1 %775 }
 0x3ac   : > { %v777_v47 = vsub.f32 %v773_v38, %v776_v46  ;;  %v1109_v38 = vld [vmem:[%s1586_s8] ss:$0 sm:$0xff]  ;;  %v916_v46 = vld [vmem:[%s1590_s12 + $0x8] sm:$0xff] }
 0x3ae   : > { %v778_v48 = vmul.f32 1.442695, %v777_v47  ;;  %v915_v47 = vld [vmem:[%s1590_s12] sm:$0xff] }
 0x3b0   : > { %1119 = vpow2.f32 %v778_v48  ;;  %v1111_v48 = vld [vmem:[%s1589_s11] ss:$0 sm:$0xff] }
 0x3b6   : > { %v1120_v49 = vpop.eup %1119 }
 0x3b7   : > { %v780_v50 = vsel %vm549_vm5, %v1120_v49, 0.0 }
 0x3b8   : > { %781 = vadd.xlane.f32.xlu0 %v780_v50 }
 0x3c1   : > { %646 = vrot.lane.b32.xlu2 %v1391_v42, %s1205_s0  ;;  %s1037_s0 = sshll.u32 %s456_s1, 3 }
 0x3c2   : > { %s458_s25 = scalar_lea.vmem [#allocation5], %s1037_s0  ;;  %s1147_s0 = scalar_lea.hbm %s1592_s14, 16 }
 0x3c3   : > { %v786_v55 = vpop.permute.xlu1 %785  ;;  %s971_s26 = sshll.u32 %s458_s25, 4  ;;  %s972_s26 = int_to_ptr.vmem [resolvable:$true] %s971_s26 }
 0x41c   : > { %v642_v51 = vpop.xlane.xlu2 %641 }
 0x41d   : > { %1121 = vrcp.f32 %v642_v51 }
 0x423   : > { %v1122_v52 = vpop.eup %1121 }
 0x424   : > { %v647_v53 = vpop.permute.xlu2 %646  ;;  %v644_v54 = vmul.f32 %v1122_v52, %v1118_v44  ;;  %v1112_v52 = vld [vmem:[%s1591_s13] ss:$0 sm:$0xff] }
 0x425   : > { %667 = vmatpush.msrb.mxu2 %v647_v53 }
 0x426   : > { %1042 = vmatmul.msk.f32.vlgmr.msrb.gmra.mxu2 %vm549_vm5, %v644_v54 }
 0x427   : > { %806 = vmatpush.msra.mxu2 %v786_v55 }
 0x42b   : > { %v782_v56 = vpop.xlane.xlu0 %781 }
 0x42c   : > { %1123 = vrcp.f32 %v782_v56 }
 0x432   : > { %v1124_v57 = vpop.eup %1123 }
 0x433   : > { %v784_v58 = vmul.f32 %v1124_v57, %v1120_v49 }
 0x435   : > { %1045 = vmatmul.msk.f32.vlgmr.msra.gmra.mxu2 %vm549_vm5, %v784_v58 }
 0x4a9   : > { %v669_v59 = vpop.f32.mrf.mxu2 }
 0x4aa   : > { %672 = vst.msk [vmem:[#allocation2] sm:$0xff] %vm606_vm7, %v669_v59 }
 0x4b8   : > { %v808_v42 = vpop.f32.mrf.mxu2 }
 0x4b9   : > { %812 = vrot.lane.b32.xlu0 %v808_v42, %s1198_s28  ;;  %s1049_s28 = sshll.u32 %s1302_s17, 3  ;;  %s959_s17 = scalar_lea.sflag [#allocation6], %s456_s1 }
 0x4ba   : > { %s969_s21 = scalar_lea.hbm %s1592_s14, %s1049_s28 }
 0x4bb   : > { %s973_s27 = sshll.u32 %s969_s21, 4  ;;  %s974_s27 = int_to_ptr.hbm [resolvable:$true] %s973_s27 }
 0x4bc   : > { %s1141_s3 = sshra.s32 %s974_s27, 4  ;;  %s1142_s3 = int_to_ptr.hbm [resolvable:$true] %s1141_s3 }
 0x4bd   : > { %s1143_s28 = scalar_lea.hbm %s1142_s3, 8  ;;  %p1148_p0 = scmp.lt.s32.totalorder %s1142_s3, %s1592_s14 }
 0x4be   : > { %p1144_p11 = scmp.ne.s32.totalorder %s1142_s3, %s1143_s28  ;;  %p1149_p1 = scmp.lt.s32.totalorder %s1147_s0, %s1143_s28 }
 0x4c0   : > { %p1145_p12 = pnand %p1144_p11, %p1319_p5  ;;  %p1150_p2 = por %p1149_p1, %p1148_p0 }
 0x4c2   : > { %p1146_p13 = pneg %p1145_p12 }
 0x4c4   : > { %p1151_p3 = pnand %p1150_p2, %p1146_p13 }
 0x52b   : > { %v813_v1 = vpop.permute.xlu0 %812 }
 0x52c   : > { %816 = vst.msk [vmem:[#allocation2] sm:$0xff] %vm815_vm9, %v813_v1 }
 0x533   : > { %v817_v2 = vld [vmem:[#allocation2] sm:$0xff] }
 0x534   : > { %1046 = vmatmul.msk.f32.vlgmr.msrb.gmra.mxu1 %vm464_vm0, %v817_v2 }
 0x5b1   : > { %v842_v4 = vpop.f32.mrf.mxu1 }
 0x5b2   : > { %v845_v5 = vadd.f32 %v842_v4, %v1334_v0  ;;  %v885_v0 = vld [vmem:[%s1588_s10 + $0x10] sm:$0xff] }
 0x5b3   : > { %907 = vmatpush.msrb.mxu3 %v885_v0 }
 0x5b4   : > { %v1463_v6 = vadd.f32 %v1108_v3, %v845_v5 }
 0x5b5   : > { %908 = vmatpush.msrb.mxu3 %v884_v16 }
 0x5b6   : > { %v851_v7 = vsel %vm464_vm0, %v1463_v6, 0.0 }
 0x5b7   : > { %852 = vadd.xlane.f32.xlu2 %v851_v7  ;;  %909 = vmatpush.msrb.mxu3 %v883_v14 }
 0x62a   : > { %v853_v9 = vpop.xlane.xlu2 %852 }
 0x62b   : > { %v854_v10 = vmul.f32 %v853_v9, %v1338_v8 }
 0x62d   : > { %v855_v11 = vsub.f32 %v1463_v6, %v854_v10 }
 0x62f   : > { %v856_v12 = vmul.f32 %v855_v11, %v855_v11 }
 0x631   : > { %v857_v13 = vsel %vm464_vm0, %v856_v12, 0.0 }
 0x632   : > { %858 = vadd.xlane.f32.xlu0 %v857_v13 }
 0x6a5   : > { %v859_v20 = vpop.xlane.xlu0 %858 }
 0x6a6   : > { %v860_v21 = vmul.f32 %v859_v20, %v1338_v8  ;;  %v924_v8 = vld [vmem:[%s1590_s12 + $0x48] sm:$0xff] }
 0x6a7   : > { %937 = vmatpush.msra.mxu0 %v924_v8 }
 0x6a8   : > { %v861_v23 = vadd.f32 1e-05, %v860_v21 }
 0x6a9   : > { %938 = vmatpush.msra.mxu0 %v923_v26 }
 0x6aa   : > { %1125 = vrsqrt.f32 %v861_v23  ;;  %vm868_vm11 = vweird.f32 %v861_v23 }
 0x6ab   : > { %939 = vmatpush.msra.mxu0 %v922_v28 }
 0x6ad   : > { %940 = vmatpush.msra.mxu0 %v921_v30 }
 0x6af   : > { %941 = vmatpush.msra.mxu0 %v920_v32 }
 0x6b0   : > { %v1126_v27 = vpop.eup %1125 }
 0x6b1   : > { %v863_v29 = vmul.f32 %v1126_v27, %v861_v23  ;;  %vm869_vm10 = vweird.f32 %v1126_v27  ;;  %942 = vmatpush.msra.mxu0 %v919_v34 }
 0x6b2   : > { %vm870_vm12 = vmor %vm868_vm11, %vm869_vm10 }
 0x6b3   : > { %v864_v31 = vmul.f32 %v1126_v27, %v863_v29  ;;  %943 = vmatpush.msra.mxu0 %v918_v36 }
 0x6b5   : > { %v865_v33 = vmul.f32 0.5, %v864_v31  ;;  %944 = vmatpush.msra.mxu0 %v917_v45 }
 0x6b7   : > { %v866_v35 = vsub.f32 1.5, %v865_v33  ;;  %945 = vmatpush.msra.mxu0 %v916_v46 }
 0x6b9   : > { %v867_v37 = vmul.f32 %v1126_v27, %v866_v35  ;;  %946 = vmatpush.msra.mxu0 %v915_v47 }
 0x6bb   : > { %v871_v39 = vsel %vm870_vm12, %v1126_v27, %v867_v37 }
 0x6bc   : > { %v872_v40 = vmul.f32 %v871_v39, %v855_v11 }
 0x6be   : > { %v877_v43 = vmul.f32 %v1109_v38, %v872_v40 }
 0x6c0   : > { %v882_v44 = vadd.f32 %v1110_v41, %v877_v43 }
 0x6c2   : > { %1047 = vmatmul.msk.f32.vlgmr.msrb.gmra.mxu3 %vm464_vm0, %v882_v44 }
 0x745   : > { %v911_v49 = vpop.f32.mrf.mxu3 }
 0x746   : > { %v912_v50 = vadd.f32 %v1111_v48, %v911_v49 }
 0x748   : > { %v914_v51 = vmax.f32 %v912_v50, 0.0 }
 0x74a   : > { %947 = vmatmul.f32.vlgmr.msra.gmra.mxu0 %v914_v51 }
 0x7c7   : > { %v948_v53 = vpop.f32.mrf.mxu0 }
 0x7c8   : > { %v951_v54 = vadd.f32 %v948_v53, %v1463_v6 }
 0x7ca   : > { %v956_v55 = vadd.f32 %v1112_v52, %v951_v54 }
 0x7cc   : > { %957 = vst.msk [vmem:[%s458_s25] sm:$0xff] %vm464_vm0, %v956_v55 }
 0x7cd   : > { %1154 = shalt.err (!%p1151_p3)
}
 0x7ce   : > { %1052 = dma.vmem_to_hbm [thread:$0]  (%p1319_p5), %s972_s26, 128, %s974_s27, %s959_s17  }
 0x7cf PF: > { %p1058_p4 = scmp.ge.s32.totalorder %s1189_s16, 2  ;;  %s985_s1 = sand.u32 1, %s1177_s29  }
 0x7d0   : > { %s986_s18 = scalar_lea.sflag [#allocation6], %s985_s1 }
 0x7d1   : > { %p1055_p7 = pnand %p1058_p4, %p1323_p6 }
 0x7d3   : > { %p1056_p8 = pneg %p1055_p7 }
 0x7d5   : > { %1172 = dma.done.wait (%p1056_p8), %s986_s18, 128  }
 0x7d6   : > { %1174 = vsyncadd (%p1056_p8), %s986_s18, 4294967168  ;;  %s1604_s3 = sld [smem:[#allocation8_spill]]  ;;  %p24_p9 = scmp.ge.s32.totalorder %s1306_s19, 4  }
 0x7d7   : > { %s1605_s29 = smov %s1181_s30  ;;  %s1606_s30 = smov %s1185_s15 }
 0x7d8   : > { %s1608_s16 = smov %s1306_s19  ;;  %26 = sbr.rel (!%p24_p9) target bundleno = 8 (0x8), region = 111 }
 0x7dc   : > { %s1607_s15 = smov %s1604_s3 }
 0x7dd   :  { %992 = vsyncpa [#allocation6], 1 }
 0x7de   :  { %994 = vsyncpa [#allocation6 + $0x1], 1 }

</bundles_post_ra>
